<compile_context>
chip_gen: v7x
topology: tpu7x:2x2x1
jax: 0.10.0
libtpu: 0.0.40
codegen_flags: <defaults>
</compile_context>

<pallas_src>
import functools

import jax
import jax.numpy as jnp
from jax.experimental import pallas as pl
from jax.experimental.pallas import tpu as pltpu


def _round_up(x: int, m: int) -> int:
    return ((x + m - 1) // m) * m


# -----------------------------------------------------------------------------
# Pallas kernel: one (batch, time-tile) per grid step.
# -----------------------------------------------------------------------------
def _quartznet_subblock_kernel(xc_ref, xh_ref, dw_ref, pw_ref, shift_ref,
                               res_ref, out_ref, *, kernel_size, t_tile,
                               dw_dtype, matmul_dtype, max_unrolled_taps):
    K = kernel_size
    # Extended tile = current T_TILE lanes + halo lanes (head of the next
    # tile); both are lane-aligned views of the same padded input.  Kept in
    # dw_dtype (bf16 on v6e/v7x) so the concat copy and all depthwise
    # VALU/XLU work is half-width.
    x_ext = jnp.concatenate([xc_ref[0], xh_ref[0]], axis=-1).astype(dw_dtype)
    n_ext = x_ext.shape[-1]                       # T_TILE + HALO (static)

    dw = dw_ref[...]                              # (C_out, K_pad) dw_dtype
    # Tap 0 (no shift).  Products in dw_dtype, accumulation in f32, and only
    # over the t_tile output columns (halo columns never reach the output).
    acc = (dw[:, 0:1] * x_ext[:, :t_tile]).astype(jnp.float32)

    if K <= max_unrolled_taps:
        # Small K: fully unrolled, independent static-shift rolls (XLU slot).
        for k in range(1, K):
            shifted = pltpu.roll(x_ext, shift=n_ext - k, axis=1)  # x_ext[:, j+k]
            acc = acc + dw[:, k:k + 1] * shifted[:, :t_tile]
    else:
        # Large K: partially-unrolled fori_loop with carried roll-by-one of
        # both the activation tile and the tap weights, so every roll shift
        # is static while the loop body (and vreg pressure) stays small.
        k_pad = dw.shape[-1]

        def body(_, carry):
            xs, dwc, a = carry
            xs = pltpu.roll(xs, shift=n_ext - 1, axis=1)    # xs[:, j] <- x[:, j+1]
            dwc = pltpu.roll(dwc, shift=k_pad - 1, axis=1)  # next tap -> col 0
            a = a + dwc[:, 0:1] * xs[:, :t_tile]
            return xs, dwc, a

        _, _, acc = jax.lax.fori_loop(1, K, body, (x_ext, dw, acc),
                                      unroll=min(8, K - 1))

    # Grouped pointwise (1x1) conv as one dense channel matmul on the MXU.
    # Group structure, ConvGroupShuffle permutation AND BatchNorm scale are
    # folded into pw_ref rows; pw bias + BN shift are folded into shift_ref.
    # TODO(synk): for groups>1 with C_out/groups >= 256 and MXU-bound shapes,
    # split into per-group matmuls instead of a block-diagonal dense weight.
    y = jnp.dot(pw_ref[...], acc.astype(matmul_dtype),
                preferred_element_type=jnp.float32)
    y = y + shift_ref[...]                        # (C_out, 1) broadcast
    y = y + res_ref[0].astype(jnp.float32)        # residual add
    out_ref[0] = jnp.maximum(y, 0.0).astype(out_ref.dtype)   # ReLU


# -----------------------------------------------------------------------------
# Wrapper
# -----------------------------------------------------------------------------
def quartznet_subblock(inputs, input_lengths, residual, params, *,
                       kernel_size, padding, groups,
                       io_dtype=jnp.bfloat16, matmul_dtype=jnp.bfloat16,
                       dw_dtype=jnp.bfloat16, t_tile=1024,
                       vmem_limit_bytes=None, max_unrolled_taps=8):
    """inputs: (B, C_in, T); residual: (B, C_out, T_out) (required).

    Generation guidance: bf16 io/matmul/dw on v6e/v7x; keep dw_dtype=f32 on
    v5e (no bf16 VALU).  t_tile 1024-2048 on v5e/v6e (128 MiB VMEM),
    512-1024 on v7x (64 MiB per TC); pass vmem_limit_bytes explicitly if the
    auto budget (capped at 56 MiB) is too small for a very large tile.
    """
    B, C_in, T = inputs.shape
    dw_w = params["dw_weight"]                 # (C_out, 1, K)   torch layout
    pw_w = params["pw_weight"]                 # (C_out, C_out//groups, 1)
    pw_b = params["pw_bias"]                   # (C_out,)
    gamma, beta = params["bn_gamma"], params["bn_beta"]
    r_mean, r_var = params["bn_mean"], params["bn_var"]
    eps = 1e-3

    C_out = dw_w.shape[0]
    K = kernel_size
    assert C_out % groups == 0 and C_out % C_in == 0
    T_out = T + 2 * padding - (K - 1)          # stride 1, dilation 1

    # --- time tiling (lane-dense, 128-multiple) ------------------------------
    halo = _round_up(max(K - 1, 1), 128)       # halo lanes carried per tile
    tt = min(t_tile, _round_up(T_out, 128))
    tt = _round_up(max(tt, halo), halo)        # multiple of 128 and of halo
    nt = pl.cdiv(T_out, tt)
    T_x = nt * tt + halo                       # padded input time length

    # --- depthwise multiplier expansion only when needed (mult > 1) ----------
    # TODO(synk): for mult > 1 do the channel expansion in-kernel (sublane
    # repeat) instead of materializing the expanded x in HBM.
    mult = C_out // C_in
    x = inputs
    if mult > 1:
        x = jnp.repeat(x, mult, axis=1)        # out ch oc reads in ch oc//mult
    # Single remaining host-side pad: fused cast+pad of x supplying the conv's
    # left/right zero padding and the tile halo.  Residual / output are NOT
    # padded: ragged last time tiles use Pallas partial reads / masked writes.
    x_pad = jnp.pad(x.astype(io_dtype),
                    ((0, 0), (0, 0), (padding, T_x - padding - T)))

    # --- depthwise taps, lane-padded to a 128 multiple ------------------------
    K_pad = _round_up(K, 128)
    dw_p = jnp.pad(dw_w[:, 0, :].astype(dw_dtype), ((0, 0), (0, K_pad - K)))

    # --- dense grouped-pointwise weight with shuffle + BN scale folded -------
    cpg = C_out // groups
    rows = jnp.arange(C_out)
    cols = jnp.arange(C_out)
    pw2 = pw_w[:, :, 0].astype(jnp.float32)                    # (C_out, cpg)
    same_group = (rows[:, None] // cpg) == (cols[None, :] // cpg)
    w_full = jnp.where(same_group, pw2[:, cols % cpg], 0.0)    # block-diagonal
    # ConvGroupShuffle: out[i] = in[(i % groups) * cpg + i // groups]
    perm = (rows % groups) * cpg + (rows // groups)
    inv_std = gamma / jnp.sqrt(r_var + eps)                    # BN scale
    # y = inv_std*(W[perm]@acc + b[perm]) + (beta - mean*inv_std)
    w_eff = (inv_std[:, None] * w_full[perm, :]).astype(matmul_dtype)
    shift_eff = (inv_std * pw_b[perm] + beta - r_mean * inv_std)[:, None]
    shift_eff = shift_eff.astype(jnp.float32)                  # (C_out, 1)

    # --- VMEM budget (generation-aware, see docstring) ------------------------
    if vmem_limit_bytes is None:
        io_b = jnp.dtype(io_dtype).itemsize
        res_b = jnp.dtype(residual.dtype).itemsize
        dw_b = jnp.dtype(dw_dtype).itemsize
        mm_b = jnp.dtype(matmul_dtype).itemsize
        bufs = 2 * C_out * ((tt + halo) * io_b + tt * (res_b + io_b))
        wgts = 2 * C_out * (K_pad * dw_b + C_out * mm_b + 128 * 4)
        interm = C_out * (2 * (tt + halo) * dw_b + 3 * tt * 4)
        vmem_limit_bytes = int(min(max(2 * (bufs + wgts + interm), 32 << 20),
                                   56 << 20))

    kern = functools.partial(_quartznet_subblock_kernel,
                             kernel_size=K, t_tile=tt, dw_dtype=dw_dtype,
                             matmul_dtype=matmul_dtype,
                             max_unrolled_taps=max_unrolled_taps)

    out = pl.pallas_call(
        kern,
        out_shape=jax.ShapeDtypeStruct((B, C_out, T_out), io_dtype),
        grid_spec=pltpu.PrefetchScalarGridSpec(
            num_scalar_prefetch=0,
            grid=(B, nt),
            in_specs=[
                # current time tile of x
                pl.BlockSpec((1, C_out, tt), lambda b, t: (b, 0, t)),
                # halo: head of the *next* tile (same array, blocked in units
                # of `halo` lanes; offset = (t+1)*tt, always in bounds)
                pl.BlockSpec((1, C_out, halo),
                             lambda b, t: (b, 0, (t + 1) * (tt // halo))),
                # TODO(synk): pipeline_mode=pl.Buffered(1) on the three
                # invariant weight operands would free one extra buffer each
                # on v7x's 64 MiB VMEM.
                pl.BlockSpec((C_out, K_pad), lambda b, t: (0, 0)),      # dw
                pl.BlockSpec((C_out, C_out), lambda b, t: (0, 0)),      # pw (dense, shuffled, BN-scaled)
                pl.BlockSpec((C_out, 1), lambda b, t: (0, 0)),          # bias+BN shift
                pl.BlockSpec((1, C_out, tt), lambda b, t: (b, 0, t)),   # residual (unpadded)
            ],
            out_specs=pl.BlockSpec((1, C_out, tt), lambda b, t: (b, 0, t)),
        ),
        compiler_params=pltpu.CompilerParams(
            dimension_semantics=("parallel", "parallel"),
            vmem_limit_bytes=vmem_limit_bytes),
    )(x_pad, x_pad, dw_p, w_eff, shift_eff, residual)

    # output lengths (same formula as nn.Conv1d; pointwise conv keeps them)
    out_lengths = (input_lengths + 2 * padding - (K - 1) - 1) // 1 + 1
    return out, out_lengths.astype(jnp.int32)


# -----------------------------------------------------------------------------
# Pure-JAX reference mirroring the PyTorch module (eval-mode BN)
# TODO(synk): training-mode BatchNorm1d (batch statistics over B,T) would need
# a cross-batch reduction pass; only inference-mode (running stats) is fused.
# -----------------------------------------------------------------------------
def reference(inputs, input_lengths, residual, params, *,
              kernel_size, padding, groups):
    C_in = inputs.shape[1]
    eps = 1e-3
    dn = ("NCH", "OIH", "NCH")
    # DepthwiseConv1d
    y = jax.lax.conv_general_dilated(
        inputs, params["dw_weight"], window_strides=(1,),
        padding=[(padding, padding)], dimension_numbers=dn,
        feature_group_count=C_in)
    lengths = (input_lengths + 2 * padding - (kernel_size - 1) - 1) // 1 + 1
    # TimeChannelSeparableConv1d (grouped 1x1)
    y = jax.lax.conv_general_dilated(
        y, params["pw_weight"], window_strides=(1,), padding=[(0, 0)],
        dimension_numbers=dn, feature_group_count=groups)
    y = y + params["pw_bias"][None, :, None]
    # ConvGroupShuffle
    B, C, T = y.shape
    y = y.reshape(B, groups, C // groups, T).transpose(0, 2, 1, 3).reshape(B, C, T)
    # BatchNorm1d (eval)
    y = (y - params["bn_mean"][None, :, None]) / jnp.sqrt(
        params["bn_var"][None, :, None] + eps)
    y = y * params["bn_gamma"][None, :, None] + params["bn_beta"][None, :, None]
    # residual + relu
    y = jnp.maximum(y + residual, 0.0)
    return y, lengths.astype(jnp.int32)


# -----------------------------------------------------------------------------
if __name__ == "__main__":
    def make_case(seed, B, C_in, C_out, T, K, padding, groups):
        T_out = T + 2 * padding - (K - 1)
        ks = jax.random.split(jax.random.PRNGKey(seed), 9)
        x = jax.random.normal(ks[0], (B, C_in, T), jnp.float32)
        lengths = jnp.full((B,), T, jnp.int32).at[-1].set(T - 3)
        residual = jax.random.normal(ks[1], (B, C_out, T_out), jnp.float32)
        params = {
            "dw_weight": jax.random.normal(ks[2], (C_out, 1, K), jnp.float32) * 0.3,
            "pw_weight": jax.random.normal(ks[3], (C_out, C_out // groups, 1),
                                           jnp.float32) * 0.3,
            "pw_bias":   jax.random.normal(ks[4], (C_out,), jnp.float32) * 0.1,
            "bn_gamma":  jax.random.uniform(ks[5], (C_out,), jnp.float32, 0.5, 1.5),
            "bn_beta":   jax.random.normal(ks[6], (C_out,), jnp.float32) * 0.1,
            "bn_mean":   jax.random.normal(ks[7], (C_out,), jnp.float32) * 0.1,
            "bn_var":    jax.random.uniform(ks[8], (C_out,), jnp.float32, 0.5, 1.5),
        }
        return x, lengths, residual, params

    cases = [
        # small shape, fully-unrolled tap path
        dict(name="K3-small", B=2, C_in=8, C_out=8, T=16, K=3, padding=1, groups=2),
        # medium shape, fori_loop tap path + ragged last time tile
        dict(name="K33-medium", B=2, C_in=16, C_out=16, T=200, K=33, padding=16, groups=4),
    ]

    for i, c in enumerate(cases):
        x, lengths, residual, params = make_case(
            i, c["B"], c["C_in"], c["C_out"], c["T"], c["K"], c["padding"], c["groups"])
        ref_out, ref_len = reference(x, lengths, residual, params,
                                     kernel_size=c["K"], padding=c["padding"],
                                     groups=c["groups"])

        # ---- strict correctness check in f32 --------------------------------
        fn32 = jax.jit(functools.partial(
            quartznet_subblock, kernel_size=c["K"], padding=c["padding"],
            groups=c["groups"], io_dtype=jnp.float32,
            matmul_dtype=jnp.float32, dw_dtype=jnp.float32))
        o32, l32 = fn32(x, lengths, residual, params)
        o32 = jax.block_until_ready(o32)
        assert o32.shape == ref_out.shape, (c["name"], o32.shape, ref_out.shape)
        assert jnp.allclose(o32, ref_out, atol=1e-4, rtol=1e-4), \
            f"f32 output mismatch: {c['name']}"
        assert jnp.array_equal(l32, ref_len), f"length mismatch: {c['name']}"

        # ---- production path: bf16 I/O + bf16 depthwise + bf16 MXU ----------
        fn16 = jax.jit(functools.partial(
            quartznet_subblock, kernel_size=c["K"], padding=c["padding"],
            groups=c["groups"], io_dtype=jnp.bfloat16,
            matmul_dtype=jnp.bfloat16, dw_dtype=jnp.bfloat16))
        o16, l16 = fn16(x, lengths, residual, params)
        o16 = jax.block_until_ready(o16)
        assert o16.shape == ref_out.shape
        assert jnp.allclose(o16.astype(jnp.float32), ref_out,
                            atol=1e-1, rtol=1e-1), \
            f"bf16 output mismatch: {c['name']}"
        assert jnp.array_equal(l16, ref_len), f"length mismatch (bf16): {c['name']}"

    print("KERNEL_OK")
</pallas_src>

<mosaic_0001>
module attributes {stable_mosaic.version = 11 : i64} {
  func.func @_quartznet_subblock_kernel(%arg0: i32, %arg1: i32, %arg2: memref<1x8x128xf32, #tpu.memory_space<vmem>>, %arg3: memref<1x8x128xf32, #tpu.memory_space<vmem>>, %arg4: memref<8x128xf32, #tpu.memory_space<vmem>>, %arg5: memref<8x8xf32, #tpu.memory_space<vmem>>, %arg6: memref<8x1xf32, #tpu.memory_space<vmem>>, %arg7: memref<1x8x128xf32, #tpu.memory_space<vmem>>, %arg8: memref<1x8x128xf32, #tpu.memory_space<vmem>>) attributes {dimension_semantics = [#tpu.dimension_semantics<parallel>, #tpu.dimension_semantics<parallel>], iteration_bounds = array<i64: 2, 1>, scalar_prefetch = 0 : i64, scratch_operands = 0 : i64, tpu.core_type = #tpu.core_type<tc>, window_params = [{transform_indices = @transform_0, window_bounds = array<i64: 1, 8, 128>}, {transform_indices = @transform_1, window_bounds = array<i64: 1, 8, 128>}, {pipeline_mode = #tpu.pipeline_mode<synchronous>, transform_indices = @transform_2, window_bounds = array<i64: 8, 128>}, {pipeline_mode = #tpu.pipeline_mode<synchronous>, transform_indices = @transform_3, window_bounds = array<i64: 8, 8>}, {pipeline_mode = #tpu.pipeline_mode<synchronous>, transform_indices = @transform_4, window_bounds = array<i64: 8, 1>}, {transform_indices = @transform_5, window_bounds = array<i64: 1, 8, 128>}, {transform_indices = @transform_6, window_bounds = array<i64: 1, 8, 128>}]} {
    %c0 = arith.constant 0 : index
    %c0_0 = arith.constant 0 : index
    %c0_1 = arith.constant 0 : index
    %0 = vector.load %arg2[%c0, %c0_0, %c0_1] : memref<1x8x128xf32, #tpu.memory_space<vmem>>, vector<1x8x128xf32>
    %1 = vector.shape_cast %0 : vector<1x8x128xf32> to vector<8x128xf32>
    %c0_2 = arith.constant 0 : index
    %c0_3 = arith.constant 0 : index
    %c0_4 = arith.constant 0 : index
    %2 = vector.load %arg3[%c0_2, %c0_3, %c0_4] : memref<1x8x128xf32, #tpu.memory_space<vmem>>, vector<1x8x128xf32>
    %3 = vector.shape_cast %2 : vector<1x8x128xf32> to vector<8x128xf32>
    %4 = tpu.concatenate %1, %3 in 1 : vector<8x128xf32>, vector<8x128xf32> -> vector<8x256xf32>
    %c0_5 = arith.constant 0 : index
    %c0_6 = arith.constant 0 : index
    %5 = vector.load %arg4[%c0_5, %c0_6] : memref<8x128xf32, #tpu.memory_space<vmem>>, vector<8x128xf32>
    %6 = vector.extract_strided_slice %5 {offsets = [0, 0], sizes = [8, 1], strides = [1, 1]} : vector<8x128xf32> to vector<8x1xf32>
    %7 = vector.extract_strided_slice %4 {offsets = [0, 0], sizes = [8, 128], strides = [1, 1]} : vector<8x256xf32> to vector<8x128xf32>
    %8 = vector.broadcast %6 : vector<8x1xf32> to vector<8x128xf32>
    %9 = arith.mulf %8, %7 : vector<8x128xf32>
    %c255_i32 = arith.constant 255 : i32
    %10 = tpu.dynamic_rotate %4 by %c255_i32 dim 1 : vector<8x256xf32>, i32 -> vector<8x256xf32>
    %11 = vector.extract_strided_slice %5 {offsets = [0, 1], sizes = [8, 1], strides = [1, 1]} : vector<8x128xf32> to vector<8x1xf32>
    %12 = vector.extract_strided_slice %10 {offsets = [0, 0], sizes = [8, 128], strides = [1, 1]} : vector<8x256xf32> to vector<8x128xf32>
    %13 = vector.broadcast %11 : vector<8x1xf32> to vector<8x128xf32>
    %14 = arith.mulf %13, %12 : vector<8x128xf32>
    %15 = arith.addf %9, %14 : vector<8x128xf32>
    %c254_i32 = arith.constant 254 : i32
    %16 = tpu.dynamic_rotate %4 by %c254_i32 dim 1 : vector<8x256xf32>, i32 -> vector<8x256xf32>
    %17 = vector.extract_strided_slice %5 {offsets = [0, 2], sizes = [8, 1], strides = [1, 1]} : vector<8x128xf32> to vector<8x1xf32>
    %18 = vector.extract_strided_slice %16 {offsets = [0, 0], sizes = [8, 128], strides = [1, 1]} : vector<8x256xf32> to vector<8x128xf32>
    %19 = vector.broadcast %17 : vector<8x1xf32> to vector<8x128xf32>
    %20 = arith.mulf %19, %18 : vector<8x128xf32>
    %21 = arith.addf %15, %20 : vector<8x128xf32>
    %c0_7 = arith.constant 0 : index
    %c0_8 = arith.constant 0 : index
    %22 = vector.load %arg5[%c0_7, %c0_8] : memref<8x8xf32, #tpu.memory_space<vmem>>, vector<8x8xf32>
    %cst = arith.constant dense<0.000000e+00> : vector<8x128xf32>
    %23 = tpu.matmul %22, %21, %cst {dimension_numbers = #tpu.dot_dimension_numbers<[1], [0], [0], [1], [0, 0, 1, 1], [], []>} : vector<8x8xf32>, vector<8x128xf32>, vector<8x128xf32> -> vector<8x128xf32>
    %c0_9 = arith.constant 0 : index
    %c0_10 = arith.constant 0 : index
    %24 = vector.load %arg6[%c0_9, %c0_10] : memref<8x1xf32, #tpu.memory_space<vmem>>, vector<8x1xf32>
    %25 = vector.broadcast %24 : vector<8x1xf32> to vector<8x128xf32>
    %26 = arith.addf %23, %25 : vector<8x128xf32>
    %c0_11 = arith.constant 0 : index
    %c0_12 = arith.constant 0 : index
    %c0_13 = arith.constant 0 : index
    %27 = vector.load %arg7[%c0_11, %c0_12, %c0_13] : memref<1x8x128xf32, #tpu.memory_space<vmem>>, vector<1x8x128xf32>
    %28 = vector.shape_cast %27 : vector<1x8x128xf32> to vector<8x128xf32>
    %29 = arith.addf %26, %28 : vector<8x128xf32>
    %cst_14 = arith.constant 0.000000e+00 : f32
    %30 = vector.broadcast %cst_14 : f32 to vector<8x128xf32>
    %31 = arith.maximumf %29, %30 : vector<8x128xf32>
    %c0_15 = arith.constant 0 : index
    %c0_16 = arith.constant 0 : index
    %c0_17 = arith.constant 0 : index
    %32 = vector.load %arg8[%c0_15, %c0_16, %c0_17] : memref<1x8x128xf32, #tpu.memory_space<vmem>>, vector<1x8x128xf32>
    %33 = vector.shape_cast %32 : vector<1x8x128xf32> to vector<8x128xf32>
    %34 = vector.shape_cast %31 : vector<8x128xf32> to vector<1x8x128xf32>
    tpu.vector_store %arg8[%c0_15, %c0_16, %c0_17], %34 {strides = array<i32>} : memref<1x8x128xf32, #tpu.memory_space<vmem>>, vector<1x8x128xf32>,
    return
  }
  func.func @transform_0(%arg0: i32, %arg1: i32) -> (i32, i32, i32) {
    %c0_i32 = arith.constant 0 : i32
    %c0_i32_0 = arith.constant 0 : i32
    return %arg0, %c0_i32, %arg1 : i32, i32, i32
  }
  func.func @transform_1(%arg0: i32, %arg1: i32) -> (i32, i32, i32) {
    %c1_i32 = arith.constant 1 : i32
    %0 = arith.addi %arg1, %c1_i32 : i32
    %c1_i32_0 = arith.constant 1 : i32
    %1 = arith.muli %0, %c1_i32_0 : i32
    %c0_i32 = arith.constant 0 : i32
    %c0_i32_1 = arith.constant 0 : i32
    return %arg0, %c0_i32, %1 : i32, i32, i32
  }
  func.func @transform_2(%arg0: i32, %arg1: i32) -> (i32, i32) {
    %c0_i32 = arith.constant 0 : i32
    %c0_i32_0 = arith.constant 0 : i32
    %c0_i32_1 = arith.constant 0 : i32
    return %c0_i32, %c0_i32_0 : i32, i32
  }
  func.func @transform_3(%arg0: i32, %arg1: i32) -> (i32, i32) {
    %c0_i32 = arith.constant 0 : i32
    %c0_i32_0 = arith.constant 0 : i32
    %c0_i32_1 = arith.constant 0 : i32
    return %c0_i32, %c0_i32_0 : i32, i32
  }
  func.func @transform_4(%arg0: i32, %arg1: i32) -> (i32, i32) {
    %c0_i32 = arith.constant 0 : i32
    %c0_i32_0 = arith.constant 0 : i32
    %c0_i32_1 = arith.constant 0 : i32
    return %c0_i32, %c0_i32_0 : i32, i32
  }
  func.func @transform_5(%arg0: i32, %arg1: i32) -> (i32, i32, i32) {
    %c0_i32 = arith.constant 0 : i32
    %c0_i32_0 = arith.constant 0 : i32
    return %arg0, %c0_i32, %arg1 : i32, i32, i32
  }
  func.func @transform_6(%arg0: i32, %arg1: i32) -> (i32, i32, i32) {
    %c0_i32 = arith.constant 0 : i32
    %c0_i32_0 = arith.constant 0 : i32
    return %arg0, %c0_i32, %arg1 : i32, i32, i32
  }
}

</mosaic_0001>

<bundles_post_ra>
// kernel: quartznet_subblock.1
= control target key start
LH: loop header
LB: loop body
LE: loop exit
PB: predicated region body
PF: predicated region fallthrough
CT: control target
= control target key end

     0   :  { %11 = vsyncpa [#allocation3], 0  ;;  %s930_s0 = inlined_call_operand.vmem [shape: f32[2,8,256], index: 0, kind: input, shape index: {}, may-alias: {0,1}]   ;;  %s931_s1 = inlined_call_operand.vmem [shape: f32[2,8,256], index: 1, kind: input, shape index: {}, may-alias: {0,1}]   ;;  %s932_s2 = inlined_call_operand.vmem [shape: f32[8,128], index: 2, kind: input, shape index: {}]   ;;  %s933_s3 = inlined_call_operand.vmem [shape: f32[8,8], index: 3, kind: input, shape index: {}]   ;;  %s934_s4 = inlined_call_operand.vmem [shape: f32[8,1], index: 4, kind: input, shape index: {}]   ;;  %s935_s5 = inlined_call_operand.vmem [shape: f32[2,8,16], index: 5, kind: input, shape index: {}]   ;;  %s936_s6 = inlined_call_operand.hbm [shape: f32[2,8,16], index: 6, kind: output, shape index: {}]  }
   0x1   :  { %13 = vsyncpa [#allocation3 + $0x1], 0  ;;  %s799_s21 = smov 0   ;;  %s801_s22 = smov 0  }
   0x2   :  { %s803_s23 = smov 0   ;;  %s805_s24 = smov 0  }
   0x3   :  { %s807_s25 = smov 0   ;;  %s809_s26 = smov 0  }
   0x4 LB: > { %s583_s27 = sadd.s32 4294967295, %s754_s26   ;;  %s584_s28 = sadd.s32 4294967294, %s754_s26   ;;  %s754_s26 = sphi %s809_s26, %s19_s26   ;;  %s750_s25 = sphi %s807_s25, %s943_s25   ;;  %s746_s24 = sphi %s805_s24, %s942_s24   ;;  %s742_s23 = sphi %s803_s23, %s941_s23   ;;  %s738_s22 = sphi %s801_s22, %s940_s22   ;;  %s734_s21 = sphi %s799_s21, %s939_s21  }
   0x5   : > { %s31_s29 = sadd.s32 1, %s750_s25  ;;  %s189_s30 = sadd.s32 1, %s742_s23 }
   0x6   : > { %p33_p0 = scmp.ge.s32.totalorder %s31_s29, 2  ;;  %p199_p1 = scmp.ne.s32.totalorder %s742_s23, %s738_s22 }
   0x7   : > { %p200_p2 = scmp.eq.s32.totalorder %s583_s27, 1  ;;  %p205_p3 = scmp.ne.s32.totalorder %s738_s22, %s734_s21 }
   0x8   : > { %s945_s29 = smov (%p33_p0, %s31_s29), 0  ;;  %p206_p5 = scmp.eq.s32.totalorder %s584_s28, 1 }
   0x9   : > { %p839_p4 = por %p200_p2, %p199_p1  ;;  %s184_s8 = ssub.s32 %s750_s25, %s945_s29 }
   0xa   : > { %p587_p6 = scmp.ge.s32.totalorder %s754_s26, 1  ;;  %p187_p7 = scmp.eq.s32.totalorder %s184_s8, 0 }
   0xb   : > { %p846_p8 = por %p206_p5, %p205_p3  ;;  %p267_p9 = scmp.lt.s32.totalorder %s754_s26, 3 }
   0xc   : > { %s852_s10 = scalar_select %p187_p7, %s742_s23, %s189_s30  }
   0xd   : > { %p268_p10 = pnand %p587_p6, %p267_p9 }
   0xe   : > { %v343_v0 = vld [vmem:[%s932_s2] sm:$0xff] (!%p268_p10)  ;;  %p316_p11 = scmp.lt.s32.totalorder (!%p268_p10), %s746_s24, 1  ;;  %v756_v1 = vmov (!%p268_p10), 2   ;;  %v757_v2 = vmov (!%p268_p10), 0   ;;  %v758_v3 = vmov (!%p268_p10), 1   ;;  %s759_s28 = smov (!%p268_p10), 127   ;;  %v354_v8 = vlaneseq (!%p268_p10) }
   0xf   : > { %271 = sbr.rel (%p268_p10) target bundleno = 394 (0x18a), region = 44  ;;  %674 = vset.pattern.permute.xlu1 (!%p268_p10), %v756_v1  ;;  %672 = vset.pattern.permute.xlu0 (!%p268_p10), %v757_v2  ;;  %s760_s30 = smov (!%p268_p10), 126   ;;  %v761_v6 = vmov (!%p268_p10), 0.0   ;;  %vm762_vm0 = vmmov (!%p268_p10), 0   ;;  %v377_v7 = vld [vmem:[%s934_s4] sm:$0xff] (!%p268_p10)  ;;  %vm383_vm3 = vcmask (!%p268_p10), 64512  }
  0x10   : > { %371 = vperm.xlu1 (!%p268_p10), %674, %v343_v0   ;;  %346 = vperm.xlu0 (!%p268_p10), %672, %v343_v0   ;;  %v355_v11 = vand.u32 (!%p268_p10), 127, %v354_v8  ;;  %v376_v24 = vld [vmem:[%s933_s3] sm:$0xff] (!%p268_p10)  ;;  %s313_s15 = sand.u32 (!%p268_p10), 1, %s738_s22  }
  0x11   : > { %605 = vmatprep.subr.mxu0 (!%p268_p10), %v761_v6  ;;  %607 = vmatprep.mubr.msk.f32.mxu0 (!%p268_p10), %vm762_vm0, %v761_v6  ;;  %s462_s12 = scalar_lea.sflag (!%p268_p10), [#allocation3], %s313_s15 }
  0x12   : > { %vm356_vm1 = vcmp.lt.s32.totalorder (!%p268_p10), %v355_v11, 127  ;;  %vm368_vm2 = vcmp.lt.s32.totalorder (!%p268_p10), %v355_v11, 126 }
  0x14   : > { %673 = vset.pattern.permute.xlu0 (!%p268_p10), %v758_v3 }
  0x15   : > { %359 = vperm.xlu0 (!%p268_p10), %673, %v343_v0  }
  0x16   : > { %s859_s13 = scalar_select %p316_p11, %s746_s24, 1 }
  0x18   : > { %s599_s14 = sshll.u32 %s859_s13, 4  ;;  %s593_s16 = sshll.u32 %s859_s13, 3 }
  0x19   : > { %s323_s17 = scalar_lea.vmem %s930_s0, %s599_s14  ;;  %s601_s18 = sadd.s32 8, %s599_s14  ;;  %675 = vset.pattern.permute.xlu0 %v757_v2 }
  0x1a   : > { %v341_v4 = vld [vmem:[%s323_s17] sm:$0xff]  ;;  %s332_s27 = scalar_lea.vmem %s931_s1, %s601_s18  ;;  %s588_s17 = sshll.u32 %s313_s15, 3 }
  0x1b   : > { %350 = vrot.lane.b32.xlu1 %v341_v4, %s759_s28  ;;  %v342_v5 = vld [vmem:[%s332_s27] sm:$0xff]  ;;  %364 = vrot.lane.b32.xlu0 %v341_v4, %s760_s30  ;;  %s340_s20 = scalar_lea.vmem %s935_s5, %s593_s16  ;;  %s596_s27 = sshll.u32 %s746_s24, 7 }
  0x1c   : > { %v457_v27 = vld [vmem:[%s340_s20] sm:$0xff]  ;;  %s883_s13 = scalar_lea.hbm %s936_s6, %s596_s27  ;;  %s763_s24 = smov [#allocation2]  }
  0x1d   : > { %s680_s16 = sshll.u32 %s763_s24, 4  ;;  %s681_s16 = int_to_ptr.vmem [resolvable:$false] %s680_s16 }
  0x1f   : > { %352 = vrot.lane.b32.xlu1 %v342_v5, %s759_s28  ;;  %380 = vperm.xlu0 %675, %v377_v7   ;;  %s315_s28 = scalar_lea.vmem [#allocation2], %s588_s17  ;;  %s682_s17 = scalar_lea.vmem %s681_s16, 256 }
  0x23   : > { %366 = vrot.lane.b32.xlu1 %v342_v5, %s760_s30  ;;  %s476_s30 = sshll.u32 %s315_s28, 4  ;;  %s885_s30 = int_to_ptr.vmem [resolvable:$true] %s476_s30 }
  0x24   : > { %s676_s14 = scalar_lea.vmem %s885_s30, 128  ;;  %p683_p1 = scmp.lt.s32.totalorder %s885_s30, %s681_s16 }
  0x25   : > { %p677_p12 = scmp.ne.s32.totalorder %s885_s30, %s676_s14  ;;  %p684_p2 = scmp.lt.s32.totalorder %s682_s17, %s676_s14 }
  0x27   : > { %p678_p13 = pnand %p677_p12, %p839_p4  ;;  %p685_p3 = por %p684_p2, %p683_p1 }
  0x29   : > { %p679_p0 = pneg %p678_p13 }
  0x2b   : > { %p686_p5 = pnand %p685_p3, %p679_p0 }
  0x8f   : > { %v372_v9 = vpop.permute.xlu1 %371  ;;  %v347_v10 = vpop.permute.xlu0 %346 }
  0x90   : > { %v349_v18 = vmul.f32 %v347_v10, %v341_v4 }
  0x93   : > { %v351_v12 = vpop.permute.xlu1 %350 }
  0x94   : > { %v360_v13 = vpop.permute.xlu0 %359 }
  0x97   : > { %v353_v14 = vpop.permute.xlu1 %352 }
  0x98   : > { %v357_v15 = vsel %vm356_vm1, %v351_v12, %v353_v14  ;;  %v365_v17 = vpop.permute.xlu0 %364 }
  0x99   : > { %v362_v16 = vmul.f32 %v360_v13, %v357_v15 }
  0x9b   : > { %v367_v19 = vpop.permute.xlu1 %366  ;;  %v363_v22 = vadd.f32 %v362_v16, %v349_v18 }
  0x9c   : > { %v369_v20 = vsel %vm368_vm2, %v365_v17, %v367_v19 }
  0x9d   : > { %v374_v21 = vmul.f32 %v372_v9, %v369_v20 }
  0x9e   : > { %v381_v25 = vpop.permute.xlu0 %380 }
  0x9f   : > { %v375_v23 = vadd.f32 %v374_v21, %v363_v22 }
  0xa1   : > { %606 = vmatpush3.msra.mxu0 %v375_v23 }
  0xa2   : > { %608 = vmatmul.mubr.msk.f32.vlgmr.msra.gmra.mrb[0].mxu0 %vm383_vm3, %v376_v24 }
 0x175   : > { %v453_v26 = vpop.f32.mrb[0].mxu0 }
 0x176   : > { %v454_v28 = vadd.f32 %v453_v26, %v381_v25  ;;  %v609_v29 = vpop.f32.mrb[1].mxu0 }
 0x178   : > { %v458_v30 = vadd.f32 %v457_v27, %v454_v28 }
 0x17a   : > { %v459_v31 = vmax.f32 %v458_v30, 0.0 }
 0x17c   : > { %460 = vst [vmem:[%s315_s28] sm:$0xff] %v459_v31 }
 0x17d   : > { %689 = shalt.err (!%p686_p5)
}
 0x17e   : > { %s690_s15 = scalar_lea.hbm %s883_s13, 128  ;;  %s694_s20 = scalar_lea.hbm %s936_s6, 256 }
 0x17f   : > { %p691_p6 = scmp.ne.s32.totalorder %s883_s13, %s690_s15  ;;  %p695_p10 = scmp.lt.u32.totalorder %s883_s13, %s936_s6 }
 0x180   : > { %p696_p11 = scmp.lt.u32.totalorder %s694_s20, %s690_s15  ;;  %p698_p13 = scmp.lt.u32.totalorder %s690_s15, %s883_s13 }
 0x181   : > { %p692_p7 = pnand %p691_p6, %p839_p4 }
 0x182   : > { %p697_p12 = por %p696_p11, %p695_p10 }
 0x183   : > { %p693_p9 = pneg %p692_p7 }
 0x184   : > { %p699_p0 = por %p698_p13, %p697_p12 }
 0x186   : > { %p700_p1 = pnand %p699_p0, %p693_p9 }
 0x188   : > { %703 = shalt.err (!%p700_p1)
}
 0x189   : > { %610 = dma.vmem_to_hbm [thread:$0]  (%p839_p4), %s885_s30, 128, %s883_s13, %s462_s12  }
 0x18a PF: > { %p616_p2 = scmp.ge.s32.totalorder %s754_s26, 2  ;;  %s488_s8 = sand.u32 1, %s734_s21  }
 0x18b   : > { %s489_s11 = scalar_lea.sflag [#allocation3], %s488_s8 }
 0x18c   : > { %p613_p3 = pnand %p616_p2, %p846_p8 }
 0x18e   : > { %729 = dma.done.wait (!%p613_p3), %s489_s11, 128  }
 0x18f   : > { %731 = vsyncadd (!%p613_p3), %s489_s11, 4294967168  ;;  %s19_s26 = sadd.s32 1, %s754_s26   ;;  %s939_s21 = smov %s738_s22 }
 0x190   : > { %p16_p5 = scmp.ge.s32.totalorder %s19_s26, 4   ;;  %s940_s22 = smov %s742_s23 }
 0x191   : > { %s941_s23 = smov %s852_s10  ;;  %s942_s24 = smov %s750_s25 }
 0x192   : > { %s943_s25 = smov %s945_s29  ;;  %18 = sbr.rel (!%p16_p5) target bundleno = 4 (0x4), region = 85 }
 0x199   :  { %494 = vsyncpa [#allocation3], 1 }
 0x19a   :  { %496 = vsyncpa [#allocation3 + $0x1], 1 }

</bundles_post_ra>
